<compile_context>
chip_gen: v5e
topology: v5e:2x2
jax: 0.10.0
libtpu: 0.0.40
codegen_flags: <defaults>
</compile_context>

<pallas_src>
from functools import partial

import numpy as np
import jax
import jax.numpy as jnp
from jax import lax
from jax.experimental import pallas as pl
from jax.experimental.pallas import tpu as pltpu

BN_EPS = 1e-5
_VMEM = pl.BlockSpec(memory_space=pltpu.MemorySpace.VMEM)


# ---------------------------------------------------------------------------
# Fused Pallas kernel: L x (GIN + ReLU + BN) -> pooling -> FF projector
# ---------------------------------------------------------------------------
def _infograph_kernel(num_layers, hid_dim, a_ref, x_ref, *refs):
    """refs layout:
        [w1_0, b1_0, w2_0, b2_0, ... (per GIN layer) ...,
         p,                                   # [G, N] one-hot pooling matrix (f32)
         ffw1, ffb1, ffw2, ffb2, ffw3, ffb3, ffws, ffbs,
         out]                                 # [G, hid*L] output (l_enc)
    """
    enc = refs[: 4 * num_layers]
    p_ref = refs[4 * num_layers]
    (ffw1_ref, ffb1_ref, ffw2_ref, ffb2_ref,
     ffw3_ref, ffb3_ref, ffws_ref, ffbs_ref) = refs[4 * num_layers + 1: 4 * num_layers + 9]
    out_ref = refs[4 * num_layers + 9]

    # A stays resident in VMEM in bf16 (exact small-integer edge counts) and is
    # reused by every layer: 1 HBM read instead of L, at half the bytes.
    a_bf16 = a_ref[...]
    p = p_ref[...]
    h = x_ref[...]                                   # f32 activations

    pools = []
    for l in range(num_layers):
        w1 = enc[4 * l + 0][...]
        b1 = enc[4 * l + 1][...]
        w2 = enc[4 * l + 2][...]
        b2 = enc[4 * l + 3][...]

        # GIN add-aggregation: bf16 x bf16 on the MXU, f32 accumulate.
        agg = jnp.dot(a_bf16, h.astype(jnp.bfloat16),
                      preferred_element_type=jnp.float32)
        z = h + agg                                  # (1 + eps) * x + sum_neighbors, eps = 0

        # GIN MLP (Linear -> ReLU -> Linear), then Encoder's outer F.relu.
        # Weights are tiny; kept f32 for precision of the downstream BN statistics.
        t = jnp.maximum(jnp.dot(z, w1, preferred_element_type=jnp.float32) + b1, 0.0)
        t = jnp.maximum(jnp.dot(t, w2, preferred_element_type=jnp.float32) + b2, 0.0)

        # BatchNorm1d (training mode): biased batch variance, weight=1 / bias=0, f32 stats.
        mean = jnp.mean(t, axis=0, keepdims=True)
        var = jnp.mean((t - mean) ** 2, axis=0, keepdims=True)
        h = (t - mean) * lax.rsqrt(var + BN_EPS)

        # global_add_pool as a one-hot matmul; pooled result stays in VMEM (no HBM writeback).
        pools.append(jnp.dot(p, h, preferred_element_type=jnp.float32))

    # FF projector, fused.  M = concat(pools, axis=1) is never materialized:
    #   M @ W == sum_l pools[l] @ W[l*hid:(l+1)*hid, :]
    # (block decomposition avoids a lane-axis concatenate and keeps everything on the MXU).
    ffw1 = ffw1_ref[...]
    ffws = ffws_ref[...]
    h1 = None
    sc = None
    for l in range(num_layers):
        w1_blk = ffw1[l * hid_dim:(l + 1) * hid_dim, :]
        ws_blk = ffws[l * hid_dim:(l + 1) * hid_dim, :]
        c1 = jnp.dot(pools[l], w1_blk, preferred_element_type=jnp.float32)
        cs = jnp.dot(pools[l], ws_blk, preferred_element_type=jnp.float32)
        h1 = c1 if h1 is None else h1 + c1
        sc = cs if sc is None else sc + cs
    h1 = jnp.maximum(h1 + ffb1_ref[...], 0.0)
    h2 = jnp.maximum(jnp.dot(h1, ffw2_ref[...], preferred_element_type=jnp.float32)
                     + ffb2_ref[...], 0.0)
    h3 = jnp.maximum(jnp.dot(h2, ffw3_ref[...], preferred_element_type=jnp.float32)
                     + ffb3_ref[...], 0.0)
    out_ref[...] = h3 + sc + ffbs_ref[...]


# ---------------------------------------------------------------------------
# Wrapper
# ---------------------------------------------------------------------------
def infograph_forward(params, x, edge_index, batch, num_graphs):
    n, d_in = x.shape
    layers = params["encoder"]
    num_layers = len(layers)
    hid = layers[0]["w2"].shape[1]
    emb = hid * num_layers

    src, dst = edge_index[0], edge_index[1]
    # Dense adjacency A[i, j] = #edges j -> i, stored in bf16 (exact small integers).
    # TODO(synk): for E << N^2 and large N, replace with CSR + scalar-prefetch gather
    # (PrefetchScalarGridSpec) and a node-tiled grid with two-pass BatchNorm so the
    # aggregation is O(E*D) and A never needs to be dense / fully VMEM-resident.
    a = jnp.zeros((n, n), jnp.float32).at[dst, src].add(1.0).astype(jnp.bfloat16)
    # One-hot pooling matrix for global_add_pool (pooling kept in f32 for exact sums).
    p = (batch[None, :] == jnp.arange(num_graphs)[:, None]).astype(jnp.float32)

    args = [a, x.astype(jnp.float32)]
    for layer in layers:
        args += [layer["w1"], layer["b1"], layer["w2"], layer["b2"]]
    args.append(p)
    ff = params["ff"]
    args += [ff["w1"], ff["b1"], ff["w2"], ff["b2"], ff["w3"], ff["b3"], ff["ws"], ff["bs"]]

    # Advisory cost estimate for the XLA scheduler around the fused call.
    flops = 0
    d_prev = d_in
    for _ in range(num_layers):
        flops += 2 * n * n * d_prev            # A @ h
        flops += 2 * n * d_prev * hid          # z @ W1
        flops += 2 * n * hid * hid             # . @ W2
        flops += 2 * num_graphs * n * hid      # pooling
        d_prev = hid
    flops += 4 * 2 * num_graphs * emb * emb    # FF block (3 matmuls) + shortcut
    in_bytes = sum(int(np.prod(t.shape)) * t.dtype.itemsize for t in args)
    cost = pl.CostEstimate(flops=int(flops),
                           transcendentals=int(num_layers * hid),
                           bytes_accessed=int(in_bytes + num_graphs * emb * 4))

    # Explicit VMEM budget (double-buffered inputs + f32 working set), clamped to
    # fit every chip generation (v7x physical VMEM is 64 MiB).
    vmem_est = int(2 * in_bytes + 8 * n * max(hid, d_in) * 4 + 4 * num_graphs * emb * 4)
    vmem_limit = min(64 * 1024 * 1024, max(32 * 1024 * 1024, 2 * vmem_est))

    kernel = partial(_infograph_kernel, num_layers, hid)
    return pl.pallas_call(
        kernel,
        out_shape=jax.ShapeDtypeStruct((num_graphs, emb), jnp.float32),
        in_specs=[_VMEM] * len(args),
        out_specs=_VMEM,
        compiler_params=pltpu.CompilerParams(vmem_limit_bytes=vmem_limit),
        cost_estimate=cost,
    )(*args)


# ---------------------------------------------------------------------------
# Deterministic parameter init (mirrors InfoGraph.init_emb: xavier_uniform W, zero bias)
# ---------------------------------------------------------------------------
def _xavier_uniform(key, fan_in, fan_out):
    limit = float(np.sqrt(6.0 / (fan_in + fan_out)))
    return jax.random.uniform(key, (fan_in, fan_out), jnp.float32, -limit, limit)


def init_params(key, inp_dim, hid_dim, num_gc_layers):
    emb_dim = hid_dim * num_gc_layers
    params = {"encoder": [], "ff": {}}
    for i in range(num_gc_layers):
        f_in = inp_dim if i == 0 else hid_dim
        key, k1, k2 = jax.random.split(key, 3)
        params["encoder"].append({
            "w1": _xavier_uniform(k1, f_in, hid_dim),
            "b1": jnp.zeros((1, hid_dim), jnp.float32),
            "w2": _xavier_uniform(k2, hid_dim, hid_dim),
            "b2": jnp.zeros((1, hid_dim), jnp.float32),
        })
    key, k1, k2, k3, k4 = jax.random.split(key, 5)
    params["ff"] = {
        "w1": _xavier_uniform(k1, emb_dim, emb_dim), "b1": jnp.zeros((1, emb_dim), jnp.float32),
        "w2": _xavier_uniform(k2, emb_dim, emb_dim), "b2": jnp.zeros((1, emb_dim), jnp.float32),
        "w3": _xavier_uniform(k3, emb_dim, emb_dim), "b3": jnp.zeros((1, emb_dim), jnp.float32),
        "ws": _xavier_uniform(k4, emb_dim, emb_dim), "bs": jnp.zeros((1, emb_dim), jnp.float32),
    }
    return params


# ---------------------------------------------------------------------------
# Pure-JAX reference (module semantics; mirrors the kernel's reviewer-endorsed
# mixed precision: bf16 operands for the aggregation matmul, f32 accumulation,
# f32 MLP / BatchNorm stats / FF).
# ---------------------------------------------------------------------------
def reference_forward(params, x, edge_index, batch, num_graphs):
    n = x.shape[0]
    a = jnp.zeros((n, n), jnp.float32).at[edge_index[1], edge_index[0]].add(1.0)
    a = a.astype(jnp.bfloat16)
    p = (batch[None, :] == jnp.arange(num_graphs)[:, None]).astype(jnp.float32)
    h = x.astype(jnp.float32)
    pools = []
    for layer in params["encoder"]:
        agg = jnp.dot(a, h.astype(jnp.bfloat16), preferred_element_type=jnp.float32)
        z = h + agg
        t = jnp.maximum(z @ layer["w1"] + layer["b1"], 0.0)
        t = jnp.maximum(t @ layer["w2"] + layer["b2"], 0.0)
        mean = t.mean(0, keepdims=True)
        var = ((t - mean) ** 2).mean(0, keepdims=True)
        h = (t - mean) / jnp.sqrt(var + BN_EPS)
        pools.append(p @ h)
    m = jnp.concatenate(pools, 1)
    ff = params["ff"]
    hh = jnp.maximum(m @ ff["w1"] + ff["b1"], 0.0)
    hh = jnp.maximum(hh @ ff["w2"] + ff["b2"], 0.0)
    hh = jnp.maximum(hh @ ff["w3"] + ff["b3"], 0.0)
    return hh + m @ ff["ws"] + ff["bs"]


# ---------------------------------------------------------------------------
if __name__ == "__main__":
    inp_dim, hid_dim, num_gc_layers = 4, 32, 3
    num_nodes, num_graphs = 12, 2
    edges_per_graph = 8

    key = jax.random.PRNGKey(0)
    key, kx, ke0, ke1 = jax.random.split(key, 4)

    # node features [num_nodes, inp_dim]
    x = jax.random.normal(kx, (num_nodes, inp_dim), jnp.float32)

    # batch assignment: first 6 nodes -> graph 0, last 6 -> graph 1
    batch = jnp.array([0] * 6 + [1] * 6, dtype=jnp.int32)

    # edges within each graph: edge_index [2, E]
    src0 = jax.random.randint(ke0, (edges_per_graph,), 0, 6)
    dst0 = jax.random.randint(jax.random.fold_in(ke0, 1), (edges_per_graph,), 0, 6)
    src1 = jax.random.randint(ke1, (edges_per_graph,), 6, 12)
    dst1 = jax.random.randint(jax.random.fold_in(ke1, 1), (edges_per_graph,), 6, 12)
    edge_index = jnp.stack([jnp.concatenate([src0, src1]),
                            jnp.concatenate([dst0, dst1])], axis=0).astype(jnp.int32)

    params = init_params(key, inp_dim, hid_dim, num_gc_layers)

    l_enc = infograph_forward(params, x, edge_index, batch, num_graphs)
    l_enc = jax.block_until_ready(l_enc)

    ref = reference_forward(params, x, edge_index, batch, num_graphs)
    np.testing.assert_allclose(np.asarray(l_enc), np.asarray(ref), rtol=1e-2, atol=1e-2)

    assert l_enc.shape == (num_graphs, hid_dim * num_gc_layers)
    print("KERNEL_OK")
</pallas_src>

<mosaic_0001>
module attributes {stable_mosaic.version = 11 : i64} {
  func.func @_infograph_kernel(%arg0: memref<12x12xbf16, #tpu.memory_space<vmem>>, %arg1: memref<12x4xf32, #tpu.memory_space<vmem>>, %arg2: memref<4x32xf32, #tpu.memory_space<vmem>>, %arg3: memref<1x32xf32, #tpu.memory_space<vmem>>, %arg4: memref<32x32xf32, #tpu.memory_space<vmem>>, %arg5: memref<1x32xf32, #tpu.memory_space<vmem>>, %arg6: memref<32x32xf32, #tpu.memory_space<vmem>>, %arg7: memref<1x32xf32, #tpu.memory_space<vmem>>, %arg8: memref<32x32xf32, #tpu.memory_space<vmem>>, %arg9: memref<1x32xf32, #tpu.memory_space<vmem>>, %arg10: memref<32x32xf32, #tpu.memory_space<vmem>>, %arg11: memref<1x32xf32, #tpu.memory_space<vmem>>, %arg12: memref<32x32xf32, #tpu.memory_space<vmem>>, %arg13: memref<1x32xf32, #tpu.memory_space<vmem>>, %arg14: memref<2x12xf32, #tpu.memory_space<vmem>>, %arg15: memref<96x96xf32, #tpu.memory_space<vmem>>, %arg16: memref<1x96xf32, #tpu.memory_space<vmem>>, %arg17: memref<96x96xf32, #tpu.memory_space<vmem>>, %arg18: memref<1x96xf32, #tpu.memory_space<vmem>>, %arg19: memref<96x96xf32, #tpu.memory_space<vmem>>, %arg20: memref<1x96xf32, #tpu.memory_space<vmem>>, %arg21: memref<96x96xf32, #tpu.memory_space<vmem>>, %arg22: memref<1x96xf32, #tpu.memory_space<vmem>>, %arg23: memref<2x96xf32, #tpu.memory_space<vmem>>) attributes {dimension_semantics = [], scalar_prefetch = 0 : i64, scratch_operands = 0 : i64, tpu.core_type = #tpu.core_type<tc>} {
    %c0 = arith.constant 0 : index
    %c0_0 = arith.constant 0 : index
    %0 = vector.load %arg0[%c0, %c0_0] : memref<12x12xbf16, #tpu.memory_space<vmem>>, vector<12x12xbf16>
    %c0_1 = arith.constant 0 : index
    %c0_2 = arith.constant 0 : index
    %1 = vector.load %arg14[%c0_1, %c0_2] : memref<2x12xf32, #tpu.memory_space<vmem>>, vector<2x12xf32>
    %c0_3 = arith.constant 0 : index
    %c0_4 = arith.constant 0 : index
    %2 = vector.load %arg1[%c0_3, %c0_4] : memref<12x4xf32, #tpu.memory_space<vmem>>, vector<12x4xf32>
    %c0_5 = arith.constant 0 : index
    %c0_6 = arith.constant 0 : index
    %3 = vector.load %arg2[%c0_5, %c0_6] : memref<4x32xf32, #tpu.memory_space<vmem>>, vector<4x32xf32>
    %c0_7 = arith.constant 0 : index
    %c0_8 = arith.constant 0 : index
    %4 = vector.load %arg3[%c0_7, %c0_8] : memref<1x32xf32, #tpu.memory_space<vmem>>, vector<1x32xf32>
    %c0_9 = arith.constant 0 : index
    %c0_10 = arith.constant 0 : index
    %5 = vector.load %arg4[%c0_9, %c0_10] : memref<32x32xf32, #tpu.memory_space<vmem>>, vector<32x32xf32>
    %c0_11 = arith.constant 0 : index
    %c0_12 = arith.constant 0 : index
    %6 = vector.load %arg5[%c0_11, %c0_12] : memref<1x32xf32, #tpu.memory_space<vmem>>, vector<1x32xf32>
    %7 = arith.truncf %2 : vector<12x4xf32> to vector<12x4xbf16>
    %cst = arith.constant dense<0.000000e+00> : vector<12x4xf32>
    %8 = tpu.matmul %0, %7, %cst {dimension_numbers = #tpu.dot_dimension_numbers<[1], [0], [0], [1], [0, 0, 1, 1], [], []>} : vector<12x12xbf16>, vector<12x4xbf16>, vector<12x4xf32> -> vector<12x4xf32>
    %9 = arith.addf %2, %8 : vector<12x4xf32>
    %cst_13 = arith.constant dense<0.000000e+00> : vector<12x32xf32>
    %10 = tpu.matmul %9, %3, %cst_13 {dimension_numbers = #tpu.dot_dimension_numbers<[1], [0], [0], [1], [0, 0, 1, 1], [], []>} : vector<12x4xf32>, vector<4x32xf32>, vector<12x32xf32> -> vector<12x32xf32>
    %11 = vector.broadcast %4 : vector<1x32xf32> to vector<12x32xf32>
    %12 = arith.addf %10, %11 : vector<12x32xf32>
    %cst_14 = arith.constant 0.000000e+00 : f32
    %13 = vector.broadcast %cst_14 : f32 to vector<12x32xf32>
    %14 = arith.maximumf %12, %13 : vector<12x32xf32>
    %cst_15 = arith.constant dense<0.000000e+00> : vector<12x32xf32>
    %15 = tpu.matmul %14, %5, %cst_15 {dimension_numbers = #tpu.dot_dimension_numbers<[1], [0], [0], [1], [0, 0, 1, 1], [], []>} : vector<12x32xf32>, vector<32x32xf32>, vector<12x32xf32> -> vector<12x32xf32>
    %16 = vector.broadcast %6 : vector<1x32xf32> to vector<12x32xf32>
    %17 = arith.addf %15, %16 : vector<12x32xf32>
    %cst_16 = arith.constant 0.000000e+00 : f32
    %18 = vector.broadcast %cst_16 : f32 to vector<12x32xf32>
    %19 = arith.maximumf %17, %18 : vector<12x32xf32>
    %cst_17 = arith.constant dense<0.000000e+00> : vector<32xf32>
    %20 = vector.multi_reduction <add>, %19, %cst_17 [0] : vector<12x32xf32> to vector<32xf32>
    %21 = vector.shape_cast %20 : vector<32xf32> to vector<1x32xf32>
    %cst_18 = arith.constant 1.200000e+01 : f32
    %22 = vector.broadcast %cst_18 : f32 to vector<1x32xf32>
    %23 = arith.divf %21, %22 : vector<1x32xf32>
    %24 = vector.broadcast %23 : vector<1x32xf32> to vector<12x32xf32>
    %25 = arith.subf %19, %24 : vector<12x32xf32>
    %26 = arith.mulf %25, %25 : vector<12x32xf32>
    %cst_19 = arith.constant dense<0.000000e+00> : vector<32xf32>
    %27 = vector.multi_reduction <add>, %26, %cst_19 [0] : vector<12x32xf32> to vector<32xf32>
    %28 = vector.shape_cast %27 : vector<32xf32> to vector<1x32xf32>
    %cst_20 = arith.constant 1.200000e+01 : f32
    %29 = vector.broadcast %cst_20 : f32 to vector<1x32xf32>
    %30 = arith.divf %28, %29 : vector<1x32xf32>
    %31 = vector.broadcast %23 : vector<1x32xf32> to vector<12x32xf32>
    %32 = arith.subf %19, %31 : vector<12x32xf32>
    %cst_21 = arith.constant 9.99999974E-6 : f32
    %33 = vector.broadcast %cst_21 : f32 to vector<1x32xf32>
    %34 = arith.addf %30, %33 : vector<1x32xf32>
    %35 = math.rsqrt %34 : vector<1x32xf32>
    %36 = vector.broadcast %35 : vector<1x32xf32> to vector<12x32xf32>
    %37 = arith.mulf %32, %36 : vector<12x32xf32>
    %cst_22 = arith.constant dense<0.000000e+00> : vector<2x32xf32>
    %38 = tpu.matmul %1, %37, %cst_22 {dimension_numbers = #tpu.dot_dimension_numbers<[1], [0], [0], [1], [0, 0, 1, 1], [], []>} : vector<2x12xf32>, vector<12x32xf32>, vector<2x32xf32> -> vector<2x32xf32>
    %c0_23 = arith.constant 0 : index
    %c0_24 = arith.constant 0 : index
    %39 = vector.load %arg6[%c0_23, %c0_24] : memref<32x32xf32, #tpu.memory_space<vmem>>, vector<32x32xf32>
    %c0_25 = arith.constant 0 : index
    %c0_26 = arith.constant 0 : index
    %40 = vector.load %arg7[%c0_25, %c0_26] : memref<1x32xf32, #tpu.memory_space<vmem>>, vector<1x32xf32>
    %c0_27 = arith.constant 0 : index
    %c0_28 = arith.constant 0 : index
    %41 = vector.load %arg8[%c0_27, %c0_28] : memref<32x32xf32, #tpu.memory_space<vmem>>, vector<32x32xf32>
    %c0_29 = arith.constant 0 : index
    %c0_30 = arith.constant 0 : index
    %42 = vector.load %arg9[%c0_29, %c0_30] : memref<1x32xf32, #tpu.memory_space<vmem>>, vector<1x32xf32>
    %43 = arith.truncf %37 : vector<12x32xf32> to vector<12x32xbf16>
    %cst_31 = arith.constant dense<0.000000e+00> : vector<12x32xf32>
    %44 = tpu.matmul %0, %43, %cst_31 {dimension_numbers = #tpu.dot_dimension_numbers<[1], [0], [0], [1], [0, 0, 1, 1], [], []>} : vector<12x12xbf16>, vector<12x32xbf16>, vector<12x32xf32> -> vector<12x32xf32>
    %45 = arith.addf %37, %44 : vector<12x32xf32>
    %cst_32 = arith.constant dense<0.000000e+00> : vector<12x32xf32>
    %46 = tpu.matmul %45, %39, %cst_32 {dimension_numbers = #tpu.dot_dimension_numbers<[1], [0], [0], [1], [0, 0, 1, 1], [], []>} : vector<12x32xf32>, vector<32x32xf32>, vector<12x32xf32> -> vector<12x32xf32>
    %47 = vector.broadcast %40 : vector<1x32xf32> to vector<12x32xf32>
    %48 = arith.addf %46, %47 : vector<12x32xf32>
    %cst_33 = arith.constant 0.000000e+00 : f32
    %49 = vector.broadcast %cst_33 : f32 to vector<12x32xf32>
    %50 = arith.maximumf %48, %49 : vector<12x32xf32>
    %cst_34 = arith.constant dense<0.000000e+00> : vector<12x32xf32>
    %51 = tpu.matmul %50, %41, %cst_34 {dimension_numbers = #tpu.dot_dimension_numbers<[1], [0], [0], [1], [0, 0, 1, 1], [], []>} : vector<12x32xf32>, vector<32x32xf32>, vector<12x32xf32> -> vector<12x32xf32>
    %52 = vector.broadcast %42 : vector<1x32xf32> to vector<12x32xf32>
    %53 = arith.addf %51, %52 : vector<12x32xf32>
    %cst_35 = arith.constant 0.000000e+00 : f32
    %54 = vector.broadcast %cst_35 : f32 to vector<12x32xf32>
    %55 = arith.maximumf %53, %54 : vector<12x32xf32>
    %cst_36 = arith.constant dense<0.000000e+00> : vector<32xf32>
    %56 = vector.multi_reduction <add>, %55, %cst_36 [0] : vector<12x32xf32> to vector<32xf32>
    %57 = vector.shape_cast %56 : vector<32xf32> to vector<1x32xf32>
    %cst_37 = arith.constant 1.200000e+01 : f32
    %58 = vector.broadcast %cst_37 : f32 to vector<1x32xf32>
    %59 = arith.divf %57, %58 : vector<1x32xf32>
    %60 = vector.broadcast %59 : vector<1x32xf32> to vector<12x32xf32>
    %61 = arith.subf %55, %60 : vector<12x32xf32>
    %62 = arith.mulf %61, %61 : vector<12x32xf32>
    %cst_38 = arith.constant dense<0.000000e+00> : vector<32xf32>
    %63 = vector.multi_reduction <add>, %62, %cst_38 [0] : vector<12x32xf32> to vector<32xf32>
    %64 = vector.shape_cast %63 : vector<32xf32> to vector<1x32xf32>
    %cst_39 = arith.constant 1.200000e+01 : f32
    %65 = vector.broadcast %cst_39 : f32 to vector<1x32xf32>
    %66 = arith.divf %64, %65 : vector<1x32xf32>
    %67 = vector.broadcast %59 : vector<1x32xf32> to vector<12x32xf32>
    %68 = arith.subf %55, %67 : vector<12x32xf32>
    %cst_40 = arith.constant 9.99999974E-6 : f32
    %69 = vector.broadcast %cst_40 : f32 to vector<1x32xf32>
    %70 = arith.addf %66, %69 : vector<1x32xf32>
    %71 = math.rsqrt %70 : vector<1x32xf32>
    %72 = vector.broadcast %71 : vector<1x32xf32> to vector<12x32xf32>
    %73 = arith.mulf %68, %72 : vector<12x32xf32>
    %cst_41 = arith.constant dense<0.000000e+00> : vector<2x32xf32>
    %74 = tpu.matmul %1, %73, %cst_41 {dimension_numbers = #tpu.dot_dimension_numbers<[1], [0], [0], [1], [0, 0, 1, 1], [], []>} : vector<2x12xf32>, vector<12x32xf32>, vector<2x32xf32> -> vector<2x32xf32>
    %c0_42 = arith.constant 0 : index
    %c0_43 = arith.constant 0 : index
    %75 = vector.load %arg10[%c0_42, %c0_43] : memref<32x32xf32, #tpu.memory_space<vmem>>, vector<32x32xf32>
    %c0_44 = arith.constant 0 : index
    %c0_45 = arith.constant 0 : index
    %76 = vector.load %arg11[%c0_44, %c0_45] : memref<1x32xf32, #tpu.memory_space<vmem>>, vector<1x32xf32>
    %c0_46 = arith.constant 0 : index
    %c0_47 = arith.constant 0 : index
    %77 = vector.load %arg12[%c0_46, %c0_47] : memref<32x32xf32, #tpu.memory_space<vmem>>, vector<32x32xf32>
    %c0_48 = arith.constant 0 : index
    %c0_49 = arith.constant 0 : index
    %78 = vector.load %arg13[%c0_48, %c0_49] : memref<1x32xf32, #tpu.memory_space<vmem>>, vector<1x32xf32>
    %79 = arith.truncf %73 : vector<12x32xf32> to vector<12x32xbf16>
    %cst_50 = arith.constant dense<0.000000e+00> : vector<12x32xf32>
    %80 = tpu.matmul %0, %79, %cst_50 {dimension_numbers = #tpu.dot_dimension_numbers<[1], [0], [0], [1], [0, 0, 1, 1], [], []>} : vector<12x12xbf16>, vector<12x32xbf16>, vector<12x32xf32> -> vector<12x32xf32>
    %81 = arith.addf %73, %80 : vector<12x32xf32>
    %cst_51 = arith.constant dense<0.000000e+00> : vector<12x32xf32>
    %82 = tpu.matmul %81, %75, %cst_51 {dimension_numbers = #tpu.dot_dimension_numbers<[1], [0], [0], [1], [0, 0, 1, 1], [], []>} : vector<12x32xf32>, vector<32x32xf32>, vector<12x32xf32> -> vector<12x32xf32>
    %83 = vector.broadcast %76 : vector<1x32xf32> to vector<12x32xf32>
    %84 = arith.addf %82, %83 : vector<12x32xf32>
    %cst_52 = arith.constant 0.000000e+00 : f32
    %85 = vector.broadcast %cst_52 : f32 to vector<12x32xf32>
    %86 = arith.maximumf %84, %85 : vector<12x32xf32>
    %cst_53 = arith.constant dense<0.000000e+00> : vector<12x32xf32>
    %87 = tpu.matmul %86, %77, %cst_53 {dimension_numbers = #tpu.dot_dimension_numbers<[1], [0], [0], [1], [0, 0, 1, 1], [], []>} : vector<12x32xf32>, vector<32x32xf32>, vector<12x32xf32> -> vector<12x32xf32>
    %88 = vector.broadcast %78 : vector<1x32xf32> to vector<12x32xf32>
    %89 = arith.addf %87, %88 : vector<12x32xf32>
    %cst_54 = arith.constant 0.000000e+00 : f32
    %90 = vector.broadcast %cst_54 : f32 to vector<12x32xf32>
    %91 = arith.maximumf %89, %90 : vector<12x32xf32>
    %cst_55 = arith.constant dense<0.000000e+00> : vector<32xf32>
    %92 = vector.multi_reduction <add>, %91, %cst_55 [0] : vector<12x32xf32> to vector<32xf32>
    %93 = vector.shape_cast %92 : vector<32xf32> to vector<1x32xf32>
    %cst_56 = arith.constant 1.200000e+01 : f32
    %94 = vector.broadcast %cst_56 : f32 to vector<1x32xf32>
    %95 = arith.divf %93, %94 : vector<1x32xf32>
    %96 = vector.broadcast %95 : vector<1x32xf32> to vector<12x32xf32>
    %97 = arith.subf %91, %96 : vector<12x32xf32>
    %98 = arith.mulf %97, %97 : vector<12x32xf32>
    %cst_57 = arith.constant dense<0.000000e+00> : vector<32xf32>
    %99 = vector.multi_reduction <add>, %98, %cst_57 [0] : vector<12x32xf32> to vector<32xf32>
    %100 = vector.shape_cast %99 : vector<32xf32> to vector<1x32xf32>
    %cst_58 = arith.constant 1.200000e+01 : f32
    %101 = vector.broadcast %cst_58 : f32 to vector<1x32xf32>
    %102 = arith.divf %100, %101 : vector<1x32xf32>
    %103 = vector.broadcast %95 : vector<1x32xf32> to vector<12x32xf32>
    %104 = arith.subf %91, %103 : vector<12x32xf32>
    %cst_59 = arith.constant 9.99999974E-6 : f32
    %105 = vector.broadcast %cst_59 : f32 to vector<1x32xf32>
    %106 = arith.addf %102, %105 : vector<1x32xf32>
    %107 = math.rsqrt %106 : vector<1x32xf32>
    %108 = vector.broadcast %107 : vector<1x32xf32> to vector<12x32xf32>
    %109 = arith.mulf %104, %108 : vector<12x32xf32>
    %cst_60 = arith.constant dense<0.000000e+00> : vector<2x32xf32>
    %110 = tpu.matmul %1, %109, %cst_60 {dimension_numbers = #tpu.dot_dimension_numbers<[1], [0], [0], [1], [0, 0, 1, 1], [], []>} : vector<2x12xf32>, vector<12x32xf32>, vector<2x32xf32> -> vector<2x32xf32>
    %c0_61 = arith.constant 0 : index
    %c0_62 = arith.constant 0 : index
    %111 = vector.load %arg15[%c0_61, %c0_62] : memref<96x96xf32, #tpu.memory_space<vmem>>, vector<96x96xf32>
    %c0_63 = arith.constant 0 : index
    %c0_64 = arith.constant 0 : index
    %112 = vector.load %arg21[%c0_63, %c0_64] : memref<96x96xf32, #tpu.memory_space<vmem>>, vector<96x96xf32>
    %113 = vector.extract_strided_slice %111 {offsets = [0, 0], sizes = [32, 96], strides = [1, 1]} : vector<96x96xf32> to vector<32x96xf32>
    %114 = vector.extract_strided_slice %112 {offsets = [0, 0], sizes = [32, 96], strides = [1, 1]} : vector<96x96xf32> to vector<32x96xf32>
    %cst_65 = arith.constant dense<0.000000e+00> : vector<2x96xf32>
    %115 = tpu.matmul %38, %113, %cst_65 {dimension_numbers = #tpu.dot_dimension_numbers<[1], [0], [0], [1], [0, 0, 1, 1], [], []>} : vector<2x32xf32>, vector<32x96xf32>, vector<2x96xf32> -> vector<2x96xf32>
    %cst_66 = arith.constant dense<0.000000e+00> : vector<2x96xf32>
    %116 = tpu.matmul %38, %114, %cst_66 {dimension_numbers = #tpu.dot_dimension_numbers<[1], [0], [0], [1], [0, 0, 1, 1], [], []>} : vector<2x32xf32>, vector<32x96xf32>, vector<2x96xf32> -> vector<2x96xf32>
    %117 = vector.extract_strided_slice %111 {offsets = [32, 0], sizes = [32, 96], strides = [1, 1]} : vector<96x96xf32> to vector<32x96xf32>
    %118 = vector.extract_strided_slice %112 {offsets = [32, 0], sizes = [32, 96], strides = [1, 1]} : vector<96x96xf32> to vector<32x96xf32>
    %cst_67 = arith.constant dense<0.000000e+00> : vector<2x96xf32>
    %119 = tpu.matmul %74, %117, %cst_67 {dimension_numbers = #tpu.dot_dimension_numbers<[1], [0], [0], [1], [0, 0, 1, 1], [], []>} : vector<2x32xf32>, vector<32x96xf32>, vector<2x96xf32> -> vector<2x96xf32>
    %cst_68 = arith.constant dense<0.000000e+00> : vector<2x96xf32>
    %120 = tpu.matmul %74, %118, %cst_68 {dimension_numbers = #tpu.dot_dimension_numbers<[1], [0], [0], [1], [0, 0, 1, 1], [], []>} : vector<2x32xf32>, vector<32x96xf32>, vector<2x96xf32> -> vector<2x96xf32>
    %121 = arith.addf %115, %119 : vector<2x96xf32>
    %122 = arith.addf %116, %120 : vector<2x96xf32>
    %123 = vector.extract_strided_slice %111 {offsets = [64, 0], sizes = [32, 96], strides = [1, 1]} : vector<96x96xf32> to vector<32x96xf32>
    %124 = vector.extract_strided_slice %112 {offsets = [64, 0], sizes = [32, 96], strides = [1, 1]} : vector<96x96xf32> to vector<32x96xf32>
    %cst_69 = arith.constant dense<0.000000e+00> : vector<2x96xf32>
    %125 = tpu.matmul %110, %123, %cst_69 {dimension_numbers = #tpu.dot_dimension_numbers<[1], [0], [0], [1], [0, 0, 1, 1], [], []>} : vector<2x32xf32>, vector<32x96xf32>, vector<2x96xf32> -> vector<2x96xf32>
    %cst_70 = arith.constant dense<0.000000e+00> : vector<2x96xf32>
    %126 = tpu.matmul %110, %124, %cst_70 {dimension_numbers = #tpu.dot_dimension_numbers<[1], [0], [0], [1], [0, 0, 1, 1], [], []>} : vector<2x32xf32>, vector<32x96xf32>, vector<2x96xf32> -> vector<2x96xf32>
    %127 = arith.addf %121, %125 : vector<2x96xf32>
    %128 = arith.addf %122, %126 : vector<2x96xf32>
    %c0_71 = arith.constant 0 : index
    %c0_72 = arith.constant 0 : index
    %129 = vector.load %arg16[%c0_71, %c0_72] : memref<1x96xf32, #tpu.memory_space<vmem>>, vector<1x96xf32>
    %130 = vector.broadcast %129 : vector<1x96xf32> to vector<2x96xf32>
    %131 = arith.addf %127, %130 : vector<2x96xf32>
    %cst_73 = arith.constant 0.000000e+00 : f32
    %132 = vector.broadcast %cst_73 : f32 to vector<2x96xf32>
    %133 = arith.maximumf %131, %132 : vector<2x96xf32>
    %c0_74 = arith.constant 0 : index
    %c0_75 = arith.constant 0 : index
    %134 = vector.load %arg17[%c0_74, %c0_75] : memref<96x96xf32, #tpu.memory_space<vmem>>, vector<96x96xf32>
    %cst_76 = arith.constant dense<0.000000e+00> : vector<2x96xf32>
    %135 = tpu.matmul %133, %134, %cst_76 {dimension_numbers = #tpu.dot_dimension_numbers<[1], [0], [0], [1], [0, 0, 1, 1], [], []>} : vector<2x96xf32>, vector<96x96xf32>, vector<2x96xf32> -> vector<2x96xf32>
    %c0_77 = arith.constant 0 : index
    %c0_78 = arith.constant 0 : index
    %136 = vector.load %arg18[%c0_77, %c0_78] : memref<1x96xf32, #tpu.memory_space<vmem>>, vector<1x96xf32>
    %137 = vector.broadcast %136 : vector<1x96xf32> to vector<2x96xf32>
    %138 = arith.addf %135, %137 : vector<2x96xf32>
    %cst_79 = arith.constant 0.000000e+00 : f32
    %139 = vector.broadcast %cst_79 : f32 to vector<2x96xf32>
    %140 = arith.maximumf %138, %139 : vector<2x96xf32>
    %c0_80 = arith.constant 0 : index
    %c0_81 = arith.constant 0 : index
    %141 = vector.load %arg19[%c0_80, %c0_81] : memref<96x96xf32, #tpu.memory_space<vmem>>, vector<96x96xf32>
    %cst_82 = arith.constant dense<0.000000e+00> : vector<2x96xf32>
    %142 = tpu.matmul %140, %141, %cst_82 {dimension_numbers = #tpu.dot_dimension_numbers<[1], [0], [0], [1], [0, 0, 1, 1], [], []>} : vector<2x96xf32>, vector<96x96xf32>, vector<2x96xf32> -> vector<2x96xf32>
    %c0_83 = arith.constant 0 : index
    %c0_84 = arith.constant 0 : index
    %143 = vector.load %arg20[%c0_83, %c0_84] : memref<1x96xf32, #tpu.memory_space<vmem>>, vector<1x96xf32>
    %144 = vector.broadcast %143 : vector<1x96xf32> to vector<2x96xf32>
    %145 = arith.addf %142, %144 : vector<2x96xf32>
    %cst_85 = arith.constant 0.000000e+00 : f32
    %146 = vector.broadcast %cst_85 : f32 to vector<2x96xf32>
    %147 = arith.maximumf %145, %146 : vector<2x96xf32>
    %148 = arith.addf %147, %128 : vector<2x96xf32>
    %c0_86 = arith.constant 0 : index
    %c0_87 = arith.constant 0 : index
    %149 = vector.load %arg22[%c0_86, %c0_87] : memref<1x96xf32, #tpu.memory_space<vmem>>, vector<1x96xf32>
    %150 = vector.broadcast %149 : vector<1x96xf32> to vector<2x96xf32>
    %151 = arith.addf %148, %150 : vector<2x96xf32>
    %c0_88 = arith.constant 0 : index
    %c0_89 = arith.constant 0 : index
    %152 = vector.load %arg23[%c0_88, %c0_89] : memref<2x96xf32, #tpu.memory_space<vmem>>, vector<2x96xf32>
    tpu.vector_store %arg23[%c0_88, %c0_89], %151 {strides = array<i32>} : memref<2x96xf32, #tpu.memory_space<vmem>>, vector<2x96xf32>,
    return
  }
}

</mosaic_0001>

<bundles_post_ra>
// kernel: tpu_custom_call.1
= control target key start
LH: loop header
LB: loop body
LE: loop exit
PB: predicated region body
PF: predicated region fallthrough
CT: control target
= control target key end

     0   :  { %s1613_s0 = inlined_call_operand.vmem [shape: bf16[12,12], index: 0, kind: input, shape index: {}]   ;;  %s1614_s1 = inlined_call_operand.vmem [shape: f32[12,4], index: 1, kind: input, shape index: {}]   ;;  %s1615_s2 = inlined_call_operand.vmem [shape: f32[4,32], index: 2, kind: input, shape index: {}]   ;;  %s1616_s3 = inlined_call_operand.vmem [shape: f32[1,32], index: 3, kind: input, shape index: {}]   ;;  %s1617_s4 = inlined_call_operand.hbm [shape: f32[32,32], index: 4, kind: input, shape index: {}]   ;;  %s1618_s5 = inlined_call_operand.vmem [shape: f32[1,32], index: 5, kind: input, shape index: {}]   ;;  %s1619_s6 = inlined_call_operand.hbm [shape: f32[32,32], index: 6, kind: input, shape index: {}]   ;;  %s1620_s7 = inlined_call_operand.vmem [shape: f32[1,32], index: 7, kind: input, shape index: {}]   ;;  %s1621_s8 = inlined_call_operand.hbm [shape: f32[32,32], index: 8, kind: input, shape index: {}]   ;;  %s1622_s9 = inlined_call_operand.vmem [shape: f32[1,32], index: 9, kind: input, shape index: {}]   ;;  %s1623_s10 = inlined_call_operand.hbm [shape: f32[32,32], index: 10, kind: input, shape index: {}]   ;;  %s1624_s11 = inlined_call_operand.vmem [shape: f32[1,32], index: 11, kind: input, shape index: {}]   ;;  %s1625_s12 = inlined_call_operand.hbm [shape: f32[32,32], index: 12, kind: input, shape index: {}]   ;;  %s1626_s13 = inlined_call_operand.vmem [shape: f32[1,32], index: 13, kind: input, shape index: {}]   ;;  %s1627_s14 = inlined_call_operand.vmem [shape: f32[2,12], index: 14, kind: input, shape index: {}]   ;;  %s1628_s15 = inlined_call_operand.hbm [shape: f32[96,96], index: 15, kind: input, shape index: {}]   ;;  %s1629_s16 = inlined_call_operand.vmem [shape: f32[1,96], index: 16, kind: input, shape index: {}]   ;;  %s1630_s17 = inlined_call_operand.hbm [shape: f32[96,96], index: 17, kind: input, shape index: {}]   ;;  %s1631_s18 = inlined_call_operand.vmem [shape: f32[1,96], index: 18, kind: input, shape index: {}]   ;;  %s1632_s19 = inlined_call_operand.hbm [shape: f32[96,96], index: 19, kind: input, shape index: {}]   ;;  %s1633_s20 = inlined_call_operand.vmem [shape: f32[1,96], index: 20, kind: input, shape index: {}]   ;;  %s1634_s21 = inlined_call_operand.hbm [shape: f32[96,96], index: 21, kind: input, shape index: {}]   ;;  %s1635_s22 = inlined_call_operand.vmem [shape: f32[1,96], index: 22, kind: input, shape index: {}]   ;;  %s1636_s23 = inlined_call_operand.hbm [shape: f32[2,96], index: 23, kind: output, shape index: {}]  }
   0x1   :  { %1639 = sst [smem:[#allocation24_spill]] %s1613_s0 }
   0x2   :  { %1640 = sst [smem:[#allocation25_spill]] %s1614_s1 }
   0x3   :  { %1641 = sst [smem:[#allocation26_spill]] %s1615_s2 }
   0x4   :  { %1642 = sst [smem:[#allocation27_spill]] %s1616_s3 }
   0x5   :  { %1643 = sst [smem:[#allocation28_spill]] %s1617_s4 }
   0x6   :  { %1644 = sst [smem:[#allocation29_spill]] %s1618_s5 }
   0x7   :  { %1645 = sst [smem:[#allocation30_spill]] %s1619_s6 }
   0x8   :  { %1646 = sst [smem:[#allocation31_spill]] %s1620_s7 }
   0x9   :  { %28 = vsyncpa [#allocation3], 0 }
   0xa   :  { %29 = vsyncpa [#allocation6], 0 }
   0xb   :  { %30 = vsyncpa [#allocation9], 0 }
   0xc   :  { %31 = vsyncpa [#allocation12], 0 }
   0xd   :  { %32 = vsyncpa [#allocation15], 0 }
   0xe   :  { %33 = vsyncpa [#allocation4], 0  ;;  %s1647_s24 = sld [smem:[#allocation30_spill]]  ;;  %s1308_s5 = smov [#allocation5]  }
   0xf   :  { %s63_s1 = sshll.u32 %s1308_s5, 4  ;;  %s91_s6 = sshll.u32 %s1623_s10, 4  ;;  %s64_s1 = int_to_ptr.vmem [resolvable:$true] %s63_s1  ;;  %s92_s6 = int_to_ptr.hbm [resolvable:$true] %s91_s6 }
  0x10   :  { %s1309_s27 = smov 128   ;;  %s1310_s7 = smov 8  }
  0x11   :  { %s1311_s28 = smov [#allocation8]   ;;  %s123_s4 = sshll.u32 %s1628_s15, 4  ;;  %s124_s4 = int_to_ptr.hbm [resolvable:$true] %s123_s4 }
  0x12   :  { %s93_s29 = sshll.u32 %s1311_s28, 4  ;;  %s1312_s5 = smov [#allocation11]   ;;  %s94_s29 = int_to_ptr.vmem [resolvable:$true] %s93_s29 }
  0x13   :  { %99 = dma.hbm_to_vmem [thread:$0]  %s92_s6, 512, %s94_s29, [#allocation9], %s1309_s27, %s1309_s27, %s1310_s7  }
  0x14   :  { %s61_s25 = sshll.u32 %s1647_s24, 4  ;;  %s153_s24 = sshll.u32 %s1632_s19, 4  ;;  %s62_s25 = int_to_ptr.hbm [resolvable:$true] %s61_s25  ;;  %s154_s24 = int_to_ptr.hbm [resolvable:$true] %s153_s24 }
  0x15   :  { %69 = dma.hbm_to_vmem [thread:$0]  %s62_s25, 512, %s64_s1, [#allocation6], %s1309_s27, %s1309_s27, %s1310_s7  }
  0x16   :  { %s125_s26 = sshll.u32 %s1312_s5, 4  ;;  %s1313_s25 = smov [#allocation14]   ;;  %s126_s26 = int_to_ptr.vmem [resolvable:$true] %s125_s26 }
  0x17   :  { %131 = dma.hbm_to_vmem [thread:$0]  %s124_s4, 1536, %s126_s26, [#allocation12], %s1309_s27, %s1309_s27, %s1310_s7  }
  0x18   :  { %s155_s15 = sshll.u32 %s1313_s25, 4  ;;  %s1648_s28 = sld [smem:[#allocation28_spill]]  ;;  %s156_s15 = int_to_ptr.vmem [resolvable:$true] %s155_s15 }
  0x19   :  { %161 = dma.hbm_to_vmem [thread:$0]  %s154_s24, 1536, %s156_s15, [#allocation15], %s1309_s27, %s1309_s27, %s1310_s7  }
  0x1a   :  { %s76_s29 = sshll.u32 %s1621_s8, 4  ;;  %s1314_s0 = smov [#allocation2]   ;;  %s77_s29 = int_to_ptr.hbm [resolvable:$true] %s76_s29 }
  0x1b   :  { %s48_s10 = sshll.u32 %s1314_s0, 4  ;;  %s1315_s4 = smov [#allocation7]   ;;  %s49_s10 = int_to_ptr.vmem [resolvable:$true] %s48_s10 }
  0x1c   :  { %s78_s30 = sshll.u32 %s1315_s4, 4  ;;  %s106_s25 = sshll.u32 %s1625_s12, 4  ;;  %s79_s30 = int_to_ptr.vmem [resolvable:$true] %s78_s30  ;;  %s107_s25 = int_to_ptr.hbm [resolvable:$true] %s106_s25 }
  0x1d   :  { %84 = dma.hbm_to_vmem [thread:$0]  %s77_s29, 512, %s79_s30, [#allocation6], %s1309_s27, %s1309_s27, %s1310_s7  }
  0x1e   :  { %s46_s3 = sshll.u32 %s1648_s28, 4  ;;  %s138_s15 = sshll.u32 %s1630_s17, 4  ;;  %s47_s3 = int_to_ptr.hbm [resolvable:$true] %s46_s3  ;;  %s139_s15 = int_to_ptr.hbm [resolvable:$true] %s138_s15 }
  0x1f   :  { %54 = dma.hbm_to_vmem [thread:$0]  %s47_s3, 512, %s49_s10, [#allocation3], %s1309_s27, %s1309_s27, %s1310_s7  }
  0x20   :  { %s1316_s1 = smov [#allocation10]   ;;  %s1317_s28 = smov [#allocation13]  }
  0x21   :  { %s108_s2 = sshll.u32 %s1316_s1, 4  ;;  %s140_s12 = sshll.u32 %s1317_s28, 4  ;;  %s109_s2 = int_to_ptr.vmem [resolvable:$true] %s108_s2  ;;  %s141_s12 = int_to_ptr.vmem [resolvable:$true] %s140_s12 }
  0x22   :  { %114 = dma.hbm_to_vmem [thread:$0]  %s107_s25, 512, %s109_s2, [#allocation9], %s1309_s27, %s1309_s27, %s1310_s7  }
  0x23   :  { %s168_s6 = sshll.u32 %s1634_s21, 4  ;;  %s1318_s17 = smov [#allocation16]   ;;  %s169_s6 = int_to_ptr.hbm [resolvable:$true] %s168_s6 }
  0x24   :  { %146 = dma.hbm_to_vmem [thread:$0]  %s139_s15, 1536, %s141_s12, [#allocation12], %s1309_s27, %s1309_s27, %s1310_s7  }
  0x25   :  { %s170_s29 = sshll.u32 %s1318_s17, 4  ;;  %s171_s29 = int_to_ptr.vmem [resolvable:$true] %s170_s29 }
  0x26   :  { %176 = dma.hbm_to_vmem [thread:$0]  %s169_s6, 1536, %s171_s29, [#allocation15], %s1309_s27, %s1309_s27, %s1310_s7  }
  0x27   :  { %1296 = dma.done.wait [#allocation3], 512  }
  0x28   :  { %1297 = vsyncadd [#allocation3], 4294966784 }
  0x29   :  { %1298 = dma.done.wait [#allocation6], 1024  }
  0x2a   :  { %1299 = vsyncadd [#allocation6], 4294966272 }
  0x2b   :  { %1300 = dma.done.wait [#allocation9], 1024  }
  0x2c   :  { %1301 = vsyncadd [#allocation9], 4294966272 }
  0x2d   :  { %1302 = dma.done.wait [#allocation12], 3072  }
  0x2e   :  { %1303 = vsyncadd [#allocation12], 4294964224 }
  0x2f   :  { %1304 = dma.done.wait [#allocation15], 3072  }
  0x30   :  { %1305 = vsyncadd [#allocation15], 4294964224  ;;  %s1649_s10 = sld [smem:[#allocation25_spill]]  ;;  %vm238_vm0 = vcmask 1045504   ;;  %vm234_vm1 = vcmask 97280   ;;  %vm268_vm2 = vcmask 1043456  }
  0x31   :  { %s1650_s5 = sld [smem:[#allocation24_spill]]  ;;  %v226_v8 = vld [vmem:[#allocation2 + $0x18] sm:$0xff]  ;;  %vm261_vm3 = vcmask 31744   ;;  %v225_v13 = vld [vmem:[#allocation2 + $0x10] sm:$0xff]  ;;  %v224_v14 = vld [vmem:[#allocation2 + $0x8] sm:$0xff]  ;;  %vm300_vm4 = vcmask 261120  }
  0x32   :  { %s1651_s15 = sld [smem:[#allocation26_spill]]  ;;  %319 = vmatpush.msra.mxu2 %v226_v8  ;;  %v223_v15 = vld [vmem:[#allocation2] sm:$0xff]  ;;  %v1319_v24 = vmov 12.0   ;;  %vm333_vm5 = vcmask 257024   ;;  %s1320_s24 = smov [#allocation17]  }
  0x33   :  { %s1652_s28 = sld [smem:[#allocation27_spill]]  ;;  %1048 = vrcp.f32 %v1319_v24  ;;  %v1536_v8 = vld [vmem:[%s1627_s14] sm:$0x3]  ;;  %s976_s2 = sshll.u32 %s1636_s23, 4  ;;  %s977_s2 = int_to_ptr.hbm [resolvable:$true] %s976_s2 }
  0x34   :  { %320 = vmatpush.msra.mxu2 %v225_v13  ;;  %s1653_s19 = sld [smem:[#allocation29_spill]]  ;;  %v404_v13 = vld [vmem:[#allocation5 + $0x8] sm:$0xff] }
  0x35   :  { %s1654_s21 = sld [smem:[#allocation31_spill]] }
  0x36   :  { %v219_v0 = vld [vmem:[%s1649_s10] sm:$0xff]  ;;  %v220_v1 = vld [vmem:[%s1649_s10 + $0x8] sm:$0xf]  ;;  %321 = vmatpush.msra.mxu2 %v224_v14 }
  0x37   :  { %v992_v2 = vld [vmem:[%s1650_s5] sm:$0xf]  ;;  %v228_v3 = vpack.c.bf16 %v220_v1, %v219_v0  ;;  %v1024_v4 = vld [vmem:[%s1650_s5] sm:$0x30] }
  0x38   :  { %v1508_v6 = vor.u32 %v1024_v4, %v992_v2  ;;  %v221_v7 = vld [vmem:[%s1651_s15] sm:$0xf]  ;;  %322 = vmatpush.msra.mxu2 %v223_v15  ;;  %v411_v15 = vld [vmem:[#allocation7 + $0x18] sm:$0xff] }
  0x39   :  { %v240_v5 = vsel %vm238_vm0, %v228_v3, 0  ;;  %995 = vmatpush.msk.msra.mxu1 %vm268_vm2, %v221_v7  ;;  %v1038_v16 = vld [vmem:[%s1652_s28] ss:$0 sm:$0xff]  ;;  %v1049_v27 = vpop.eup %1048 }
  0x3a   :  { %249 = vmatpush.bf16.msra.mxu0 %v240_v5  ;;  %v1039_v25 = vld [vmem:[%s1653_s19] ss:$0 sm:$0xff]  ;;  %v343_v31 = vmul.f32 12.0, %v1049_v27  ;;  %vm347_vm6 = vweird.f32 %v1049_v27 }
  0x3b   :  { %v403_v14 = vld [vmem:[#allocation5] sm:$0xff] }
  0x3c   :  { %v344_v35 = vsub.f32 1.0, %v343_v31  ;;  %v1040_v24 = vld [vmem:[%s1654_s21] ss:$0 sm:$0xff] }
  0x3d   :  { %994 = vmatmul.msk.bf16.vlgmr.msra.gmra.mxu0 %vm234_vm1, %v1508_v6 }
  0x3e   :  { %v345_v38 = vmul.f32 %v1049_v27, %v344_v35  ;;  %488 = vmatpush.msrb.mxu0 %v411_v15  ;;  %v737_v15 = vld [vmem:[#allocation16 + $0x30] sm:$0xff] }
  0x40   :  { %v346_v41 = vadd.f32 %v1049_v27, %v345_v38 }
  0x42   :  { %v1526_v44 = vsel %vm347_vm6, %v1049_v27, %v346_v41 }
  0xba   :  { %v251_v9 = vpop.f32.mrf.mxu0 }
  0xbb   :  { %v256_v10 = vadd.f32 %v251_v9, %v219_v0 }
  0xbd   :  { %996 = vmatmul.msk.f32.vlgmr.msra.gmra.mxu1 %vm261_vm3, %v256_v10 }
  0xc2   :  { %v253_v11 = vpop.f32.mrf.mxu0 }
  0xc3   :  { %v257_v12 = vadd.f32 %v253_v11, %v220_v1  ;;  %v406_v11 = vld [vmem:[#allocation5 + $0x18] sm:$0xff] }
  0xc4   :  { %454 = vmatpush.msrb.mxu1 %v406_v11 }
  0xc5   :  { %997 = vmatmul.msk.f32.gmra.mxu1 %vm261_vm3, %v257_v12  ;;  %v405_v12 = vld [vmem:[#allocation5 + $0x10] sm:$0xff] }
  0xc6   :  { %455 = vmatpush.msrb.mxu1 %v405_v12  ;;  %v738_v12 = vld [vmem:[#allocation16 + $0x38] sm:$0xff] }
  0xc8   :  { %456 = vmatpush.msrb.mxu1 %v404_v13  ;;  %v564_v13 = vld [vmem:[#allocation8 + $0x18] sm:$0xff] }
  0xca   :  { %457 = vmatpush.msrb.mxu1 %v403_v14 }
 0x13a   :  { %v289_v17 = vpop.f32.mrf.mxu1 }
 0x13b   :  { %v290_v18 = vadd.f32 %v1038_v16, %v289_v17 }
 0x13d   :  { %v295_v19 = vmax.f32 %v290_v18, 0.0 }
 0x13f   :  { %998 = vmatmul.msk.f32.vlgmr.msra.gmra.mxu2 %vm300_vm4, %v295_v19 }
 0x142   :  { %v292_v20 = vpop.f32.mrf.mxu1 }
 0x143   :  { %v293_v21 = vadd.f32 %v1038_v16, %v292_v20 }
 0x145   :  { %v296_v22 = vmax.f32 %v293_v21, 0.0  ;;  %v410_v21 = vld [vmem:[#allocation7 + $0x10] sm:$0xff] }
 0x146   :  { %489 = vmatpush.msrb.mxu0 %v410_v21  ;;  %v562_v21 = vld [vmem:[#allocation8 + $0x8] sm:$0xff] }
 0x147   :  { %999 = vmatmul.msk.f32.gmra.mxu2 %vm300_vm4, %v296_v22  ;;  %v409_v22 = vld [vmem:[#allocation7 + $0x8] sm:$0xff] }
 0x148   :  { %490 = vmatpush.msrb.mxu0 %v409_v22  ;;  %v721_v22 = vld [vmem:[#allocation11 + $0x10] sm:$0xff] }
 0x1c2   :  { %v324_v23 = vpop.f32.mrf.mxu2 }
 0x1c3   :  { %v325_v26 = vadd.f32 %v1039_v25, %v324_v23  ;;  %v408_v23 = vld [vmem:[#allocation7] sm:$0xff] }
 0x1c4   :  { %491 = vmatpush.msrb.mxu0 %v408_v23  ;;  %v561_v23 = vld [vmem:[#allocation8] sm:$0xff] }
 0x1c5   :  { %v330_v29 = vmax.f32 %v325_v26, 0.0 }
 0x1c7   :  { %v332_v33 = vsel %vm300_vm4, %v330_v29, 0.0 }
 0x1ca   :  { %v327_v28 = vpop.f32.mrf.mxu2 }
 0x1cb   :  { %v328_v30 = vadd.f32 %v1039_v25, %v327_v28 }
 0x1cd   :  { %v331_v32 = vmax.f32 %v328_v30, 0.0 }
 0x1cf   :  { %v334_v34 = vsel %vm333_vm5, %v331_v32, 0.0 }
 0x1d0   :  { %v335_v36 = vadd.f32 %v334_v34, %v332_v33 }
 0x1d2   :  { %v336_v37 = vrot.slane %v335_v36, 4 }
 0x1d4   :  { %v337_v39 = vadd.f32 %v336_v37, %v335_v36 }
 0x1d6   :  { %v338_v40 = vrot.slane %v337_v39, 2 }
 0x1d8   :  { %v339_v42 = vadd.f32 %v338_v40, %v337_v39 }
 0x1da   :  { %v340_v43 = vrot.slane %v339_v42, 1 }
 0x1dc   :  { %v341_v45 = vadd.f32 %v340_v43, %v339_v42 }
 0x1de   :  { %v349_v46 = vmul.f32 %v1526_v44, %v341_v45 }
 0x1e0   :  { %v350_v47 = vsub.f32 %v330_v29, %v349_v46  ;;  %v351_v48 = vsub.f32 %v331_v32, %v349_v46  ;;  %v1041_v32 = vld [vmem:[%s1622_s9] ss:$0 sm:$0xff] }
 0x1e2   :  { %v352_v49 = vmul.f32 %v350_v47, %v350_v47  ;;  %v353_v50 = vmul.f32 %v351_v48, %v351_v48 }
 0x1e4   :  { %v354_v51 = vsel %vm300_vm4, %v352_v49, 0.0  ;;  %v355_v52 = vsel %vm333_vm5, %v353_v50, 0.0 }
 0x1e5   :  { %v356_v53 = vadd.f32 %v355_v52, %v354_v51 }
 0x1e7   :  { %v357_v54 = vrot.slane %v356_v53, 4 }
 0x1e9   :  { %v358_v55 = vadd.f32 %v357_v54, %v356_v53 }
 0x1eb   :  { %v359_v56 = vrot.slane %v358_v55, 2 }
 0x1ed   :  { %v360_v57 = vadd.f32 %v359_v56, %v358_v55 }
 0x1ef   :  { %v361_v58 = vrot.slane %v360_v57, 1 }
 0x1f1   :  { %v362_v59 = vadd.f32 %v361_v58, %v360_v57 }
 0x1f3   :  { %v363_v60 = vmul.f32 %v362_v59, %v1526_v44 }
 0x1f5   :  { %v364_v61 = vadd.f32 1e-05, %v363_v60 }
 0x1f7   :  { %1050 = vrsqrt.f32 %v364_v61  ;;  %vm371_vm8 = vweird.f32 %v364_v61 }
 0x1fd   :  { %v1051_v62 = vpop.eup %1050 }
 0x1fe   :  { %v366_v63 = vmul.f32 %v1051_v62, %v364_v61  ;;  %vm372_vm7 = vweird.f32 %v1051_v62 }
 0x1ff   :  { %vm373_vm9 = vmor %vm371_vm8, %vm372_vm7 }
 0x200   :  { %v367_v0 = vmul.f32 %v1051_v62, %v366_v63 }
 0x202   :  { %v368_v1 = vmul.f32 0.5, %v367_v0 }
 0x204   :  { %v369_v2 = vsub.f32 1.5, %v368_v1 }
 0x206   :  { %v370_v3 = vmul.f32 %v1051_v62, %v369_v2 }
 0x208   :  { %v374_v4 = vsel %vm373_vm9, %v1051_v62, %v370_v3 }
 0x209   :  { %v376_v5 = vmul.f32 %v374_v4, %v351_v48  ;;  %v375_v7 = vmul.f32 %v374_v4, %v350_v47 }
 0x20b   :  { %1000 = vmatpush.msk.msra.mxu3 %vm268_vm2, %v376_v5  ;;  %v413_v9 = vpack.c.bf16 %v376_v5, %v375_v7 }
 0x20d   :  { %398 = vmatpush.msra.mxu3 %v375_v7  ;;  %v415_v10 = vsel %vm238_vm0, %v413_v9, 0 }
 0x20e   :  { %1001 = vmatmul.msk.f32.vlgmr.msra.gmra.mxu3 %vm234_vm1, %v1536_v8 }
 0x20f   :  { %424 = vmatpush.bf16.msrb.mxu3 %v415_v10 }
 0x216   :  { %1002 = vmatmul.msk.bf16.vlgmr.msrb.gmra.mxu3 %vm234_vm1, %v1508_v6 }
 0x291   :  { %v1543_v16 = vpop.f32.mrf.mxu3 }
 0x299   :  { %v426_v17 = vpop.f32.mrf.mxu3 }
 0x29a   :  { %v431_v18 = vadd.f32 %v426_v17, %v375_v7  ;;  %v736_v17 = vld [vmem:[#allocation16 + $0x28] sm:$0xff] }
 0x29c   :  { %1003 = vmatmul.msk.f32.vlgmr.msrb.gmra.mxu1 %vm300_vm4, %v431_v18  ;;  %v735_v18 = vld [vmem:[#allocation16 + $0x20] sm:$0xff] }
 0x2a1   :  { %v428_v19 = vpop.f32.mrf.mxu3 }
 0x2a2   :  { %v432_v20 = vadd.f32 %v428_v19, %v376_v5  ;;  %v563_v19 = vld [vmem:[#allocation8 + $0x10] sm:$0xff] }
 0x2a4   :  { %1004 = vmatmul.msk.f32.gmra.mxu1 %vm300_vm4, %v432_v20  ;;  %v722_v20 = vld [vmem:[#allocation11 + $0x18] sm:$0xff] }
 0x319   :  { %v459_v25 = vpop.f32.mrf.mxu1 }
 0x31a   :  { %v460_v26 = vadd.f32 %v1040_v24, %v459_v25  ;;  %v719_v25 = vld [vmem:[#allocation11] sm:$0xff] }
 0x31c   :  { %v465_v27 = vmax.f32 %v460_v26, 0.0 }
 0x31e   :  { %1005 = vmatmul.msk.f32.vlgmr.msrb.gmra.mxu0 %vm300_vm4, %v465_v27 }
 0x321   :  { %v462_v28 = vpop.f32.mrf.mxu1 }
 0x322   :  { %v463_v29 = vadd.f32 %v1040_v24, %v462_v28  ;;  %v720_v24 = vld [vmem:[#allocation11 + $0x8] sm:$0xff] }
 0x324   :  { %v466_v30 = vmax.f32 %v463_v29, 0.0 }
 0x326   :  { %1006 = vmatmul.msk.f32.gmra.mxu0 %vm300_vm4, %v466_v30  ;;  %v569_v30 = vld [vmem:[#allocation10 + $0x18] sm:$0xff] }
 0x327   :  { %646 = vmatpush.msra.mxu1 %v569_v30  ;;  %v732_v30 = vld [vmem:[#allocation16 + $0x8] sm:$0xff] }
 0x39b   :  { %v493_v31 = vpop.f32.mrf.mxu0 }
 0x39c   :  { %v494_v33 = vadd.f32 %v1041_v32, %v493_v31  ;;  %v568_v31 = vld [vmem:[#allocation10 + $0x10] sm:$0xff] }
 0x39d   :  { %647 = vmatpush.msra.mxu1 %v568_v31  ;;  %v731_v31 = vld [vmem:[#allocation16] sm:$0xff] }
 0x39e   :  { %v499_v35 = vmax.f32 %v494_v33, 0.0  ;;  %v566_v33 = vld [vmem:[#allocation10] sm:$0xff] }
 0x3a0   :  { %v501_v38 = vsel %vm300_vm4, %v499_v35, 0.0 }
 0x3a3   :  { %v496_v34 = vpop.f32.mrf.mxu0 }
 0x3a4   :  { %v497_v36 = vadd.f32 %v1041_v32, %v496_v34  ;;  %v567_v32 = vld [vmem:[#allocation10 + $0x8] sm:$0xff]  ;;  %v1042_v34 = vld [vmem:[%s1624_s11] ss:$0 sm:$0xff] }
 0x3a5   :  { %648 = vmatpush.msra.mxu1 %v567_v32  ;;  %v730_v32 = vld [vmem:[#allocation11 + $0x58] sm:$0xff] }
 0x3a6   :  { %v500_v37 = vmax.f32 %v497_v36, 0.0 }
 0x3a7   :  { %649 = vmatpush.msra.mxu1 %v566_v33  ;;  %v728_v33 = vld [vmem:[#allocation11 + $0x48] sm:$0xff] }
 0x3a8   :  { %v502_v39 = vsel %vm333_vm5, %v500_v37, 0.0 }
 0x3a9   :  { %v503_v40 = vadd.f32 %v502_v39, %v501_v38 }
 0x3ab   :  { %v504_v41 = vrot.slane %v503_v40, 4 }
 0x3ad   :  { %v505_v42 = vadd.f32 %v504_v41, %v503_v40 }
 0x3af   :  { %v506_v43 = vrot.slane %v505_v42, 2 }
 0x3b1   :  { %v507_v45 = vadd.f32 %v506_v43, %v505_v42  ;;  %v1043_v42 = vld [vmem:[%s1626_s13] ss:$0 sm:$0xff] }
 0x3b3   :  { %v508_v46 = vrot.slane %v507_v45, 1 }
 0x3b5   :  { %v509_v47 = vadd.f32 %v508_v46, %v507_v45 }
 0x3b7   :  { %v510_v48 = vmul.f32 %v509_v47, %v1526_v44 }
 0x3b9   :  { %v511_v49 = vsub.f32 %v499_v35, %v510_v48  ;;  %v512_v50 = vsub.f32 %v500_v37, %v510_v48 }
 0x3bb   :  { %v513_v51 = vmul.f32 %v511_v49, %v511_v49  ;;  %v514_v52 = vmul.f32 %v512_v50, %v512_v50 }
 0x3bd   :  { %v515_v53 = vsel %vm300_vm4, %v513_v51, 0.0  ;;  %v516_v54 = vsel %vm333_vm5, %v514_v52, 0.0 }
 0x3be   :  { %v517_v55 = vadd.f32 %v516_v54, %v515_v53 }
 0x3c0   :  { %v518_v56 = vrot.slane %v517_v55, 4 }
 0x3c2   :  { %v519_v57 = vadd.f32 %v518_v56, %v517_v55 }
 0x3c4   :  { %v520_v58 = vrot.slane %v519_v57, 2 }
 0x3c6   :  { %v521_v59 = vadd.f32 %v520_v58, %v519_v57 }
 0x3c8   :  { %v522_v60 = vrot.slane %v521_v59, 1 }
 0x3ca   :  { %v523_v61 = vadd.f32 %v522_v60, %v521_v59 }
 0x3cc   :  { %v524_v62 = vmul.f32 %v523_v61, %v1526_v44 }
 0x3ce   :  { %v525_v63 = vadd.f32 1e-05, %v524_v62 }
 0x3d0   :  { %1052 = vrsqrt.f32 %v525_v63  ;;  %vm532_vm11 = vweird.f32 %v525_v63 }
 0x3d6   :  { %v1053_v0 = vpop.eup %1052 }
 0x3d7   :  { %v527_v1 = vmul.f32 %v1053_v0, %v525_v63  ;;  %vm533_vm10 = vweird.f32 %v1053_v0 }
 0x3d8   :  { %vm534_vm12 = vmor %vm532_vm11, %vm533_vm10 }
 0x3d9   :  { %v528_v2 = vmul.f32 %v1053_v0, %v527_v1 }
 0x3db   :  { %v529_v3 = vmul.f32 0.5, %v528_v2 }
 0x3dd   :  { %v530_v4 = vsub.f32 1.5, %v529_v3 }
 0x3df   :  { %v531_v5 = vmul.f32 %v1053_v0, %v530_v4 }
 0x3e1   :  { %v535_v7 = vsel %vm534_vm12, %v1053_v0, %v531_v5 }
 0x3e2   :  { %v537_v9 = vmul.f32 %v535_v7, %v512_v50  ;;  %v536_v10 = vmul.f32 %v535_v7, %v511_v49 }
 0x3e4   :  { %1007 = vmatpush.msk.msrb.mxu2 %vm268_vm2, %v537_v9  ;;  %v571_v11 = vpack.c.bf16 %v537_v9, %v536_v10 }
 0x3e6   :  { %556 = vmatpush.msrb.mxu2 %v536_v10  ;;  %v573_v14 = vsel %vm238_vm0, %v571_v11, 0  ;;  %vm896_vm0 = vcmask 785408  }
 0x3e7   :  { %1008 = vmatmul.msk.f32.vlgmr.msrb.gmra.mxu2 %vm234_vm1, %v1536_v8  ;;  %582 = vmatpush.bf16.msra.mxu3 %v573_v14  ;;  %v742_v14 = vld [vmem:[#allocation16 + $0x58] sm:$0xff] }
 0x3e8   :  { %612 = vmatpush.msra.mxu2 %v564_v13 }
 0x3ea   :  { %1009 = vmatmul.msk.bf16.vlgmr.msra.gmra.mxu3 %vm234_vm1, %v1508_v6  ;;  %613 = vmatpush.msra.mxu2 %v563_v19  ;;  %v740_v19 = vld [vmem:[#allocation16 + $0x48] sm:$0xff] }
 0x3eb   :  { %778 = vmatpush.msrb.mxu3 %v738_v12 }
 0x3ec   :  { %614 = vmatpush.msra.mxu2 %v562_v21 }
 0x3ed   :  { %779 = vmatpush.msrb.mxu3 %v737_v15 }
 0x3ee   :  { %615 = vmatpush.msra.mxu2 %v561_v23 }
 0x3ef   :  { %780 = vmatpush.msrb.mxu3 %v736_v17  ;;  %v741_v17 = vld [vmem:[#allocation16 + $0x50] sm:$0xff] }
 0x3f1   :  { %781 = vmatpush.msrb.mxu3 %v735_v18 }
 0x3f3   :  { %801 = vmatpush.msra.mxu3 %v722_v20 }
 0x3f5   :  { %802 = vmatpush.msra.mxu3 %v721_v22 }
 0x3f7   :  { %803 = vmatpush.msra.mxu3 %v720_v24  ;;  %v726_v24 = vld [vmem:[#allocation11 + $0x38] sm:$0xff] }
 0x3f9   :  { %804 = vmatpush.msra.mxu3 %v719_v25  ;;  %v725_v25 = vld [vmem:[#allocation11 + $0x30] sm:$0xff] }
 0x46a   :  { %v1567_v6 = vpop.f32.mrf.mxu2 }
 0x46b   :  { %1017 = vmatmul.msk.f32.vlgmr.msrb.gmra.mxu3 %vm300_vm4, %v1567_v6 }
 0x46c   :  { %864 = vmatpush.msrb.mxu3 %v742_v14 }
 0x46d   :  { %v584_v26 = vpop.f32.mrf.mxu3 }
 0x46e   :  { %v589_v27 = vadd.f32 %v584_v26, %v536_v10  ;;  %865 = vmatpush.msrb.mxu3 %v741_v17  ;;  %v724_v26 = vld [vmem:[#allocation11 + $0x28] sm:$0xff] }
 0x470   :  { %1010 = vmatmul.msk.f32.vlgmr.msra.gmra.mxu2 %vm300_vm4, %v589_v27  ;;  %866 = vmatpush.msrb.mxu3 %v740_v19  ;;  %v723_v27 = vld [vmem:[#allocation11 + $0x20] sm:$0xff] }
 0x473   :  { %1018 = vmatmul.msk.f32.vlgmr.msra.gmra.mxu3 %vm300_vm4, %v1543_v16 }
 0x475   :  { %v586_v28 = vpop.f32.mrf.mxu3 }
 0x476   :  { %v590_v29 = vadd.f32 %v586_v28, %v537_v9  ;;  %v734_v28 = vld [vmem:[#allocation16 + $0x18] sm:$0xff] }
 0x478   :  { %1011 = vmatmul.msk.f32.gmra.mxu2 %vm300_vm4, %v590_v29  ;;  %v733_v29 = vld [vmem:[#allocation16 + $0x10] sm:$0xff] }
 0x4f3   :  { %v617_v35 = vpop.f32.mrf.mxu2 }
 0x4f4   :  { %v618_v36 = vadd.f32 %v1042_v34, %v617_v35  ;;  %v739_v35 = vld [vmem:[#allocation16 + $0x40] sm:$0xff] }
 0x4f5   :  { %867 = vmatpush.msrb.mxu3 %v739_v35 }
 0x4f6   :  { %v623_v37 = vmax.f32 %v618_v36, 0.0  ;;  %v890_v36 = vld [vmem:[#allocation13 + $0x50] sm:$0xff] }
 0x4f8   :  { %1012 = vmatmul.msk.f32.vlgmr.msra.gmra.mxu1 %vm300_vm4, %v623_v37  ;;  %v889_v37 = vld [vmem:[#allocation13 + $0x48] sm:$0xff] }
 0x4fb   :  { %v620_v38 = vpop.f32.mrf.mxu2 }
 0x4fc   :  { %v621_v39 = vadd.f32 %v1042_v34, %v620_v38  ;;  %v727_v34 = vld [vmem:[#allocation11 + $0x40] sm:$0xff] }
 0x4fd   :  { %v888_v38 = vld [vmem:[#allocation13 + $0x40] sm:$0xff] }
 0x4fe   :  { %v624_v40 = vmax.f32 %v621_v39, 0.0  ;;  %v887_v39 = vld [vmem:[#allocation13 + $0x38] sm:$0xff] }
 0x500   :  { %1013 = vmatmul.msk.f32.gmra.mxu1 %vm300_vm4, %v624_v40  ;;  %v886_v40 = vld [vmem:[#allocation13 + $0x30] sm:$0xff] }
 0x575   :  { %v651_v41 = vpop.f32.mrf.mxu1 }
 0x576   :  { %v652_v43 = vadd.f32 %v1043_v42, %v651_v41  ;;  %v884_v41 = vld [vmem:[#allocation13 + $0x20] sm:$0xff] }
 0x578   :  { %v657_v46 = vmax.f32 %v652_v43, 0.0  ;;  %v883_v43 = vld [vmem:[#allocation13 + $0x18] sm:$0xff] }
 0x57a   :  { %v659_v49 = vsel %vm300_vm4, %v657_v46, 0.0 }
 0x57d   :  { %v654_v45 = vpop.f32.mrf.mxu1 }
 0x57e   :  { %v655_v47 = vadd.f32 %v1043_v42, %v654_v45  ;;  %v882_v45 = vld [vmem:[#allocation13 + $0x10] sm:$0xff] }
 0x580   :  { %v658_v48 = vmax.f32 %v655_v47, 0.0  ;;  %v880_v47 = vld [vmem:[#allocation13] sm:$0xff] }
 0x582   :  { %v660_v50 = vsel %vm333_vm5, %v658_v48, 0.0 }
 0x583   :  { %v661_v51 = vadd.f32 %v660_v50, %v659_v49  ;;  %v931_v49 = vld [vmem:[#allocation14 + $0x50] sm:$0xff]  ;;  %v930_v50 = vld [vmem:[#allocation14 + $0x48] sm:$0xff] }
 0x585   :  { %v662_v52 = vrot.slane %v661_v51, 4 }
 0x587   :  { %v663_v53 = vadd.f32 %v662_v52, %v661_v51  ;;  %v929_v51 = vld [vmem:[#allocation14 + $0x40] sm:$0xff]  ;;  %v928_v52 = vld [vmem:[#allocation14 + $0x38] sm:$0xff] }
 0x589   :  { %v664_v54 = vrot.slane %v663_v53, 2 }
 0x58b   :  { %v665_v55 = vadd.f32 %v664_v54, %v663_v53  ;;  %v927_v54 = vld [vmem:[#allocation14 + $0x30] sm:$0xff] }
 0x58d   :  { %v666_v56 = vrot.slane %v665_v55, 1 }
 0x58f   :  { %v667_v57 = vadd.f32 %v666_v56, %v665_v55  ;;  %v926_v55 = vld [vmem:[#allocation14 + $0x28] sm:$0xff]  ;;  %v925_v56 = vld [vmem:[#allocation14 + $0x20] sm:$0xff] }
 0x591   :  { %v668_v58 = vmul.f32 %v667_v57, %v1526_v44  ;;  %v783_v57 = vpop.f32.mrf.mxu3 }
 0x593   :  { %v669_v59 = vsub.f32 %v657_v46, %v668_v58  ;;  %v670_v60 = vsub.f32 %v658_v48, %v668_v58  ;;  %v881_v46 = vld [vmem:[#allocation13 + $0x8] sm:$0xff]  ;;  %v932_v48 = vld [vmem:[#allocation14 + $0x58] sm:$0xff] }
 0x594   :  { %944 = vmatpush.msrb.mxu1 %v932_v48  ;;  %v924_v58 = vld [vmem:[#allocation14 + $0x18] sm:$0xff] }
 0x595   :  { %v671_v61 = vmul.f32 %v669_v59, %v669_v59  ;;  %v672_v62 = vmul.f32 %v670_v60, %v670_v60 }
 0x596   :  { %945 = vmatpush.msrb.mxu1 %v931_v49 }
 0x597   :  { %v673_v63 = vsel %vm300_vm4, %v671_v61, 0.0  ;;  %v674_v0 = vsel %vm333_vm5, %v672_v62, 0.0  ;;  %v1044_v62 = vld [vmem:[%s1629_s16] ss:$0 sm:$0xff] }
 0x598   :  { %v675_v1 = vadd.f32 %v674_v0, %v673_v63  ;;  %946 = vmatpush.msrb.mxu1 %v930_v50 }
 0x59a   :  { %v676_v2 = vrot.slane %v675_v1, 4  ;;  %947 = vmatpush.msrb.mxu1 %v929_v51 }
 0x59c   :  { %v677_v3 = vadd.f32 %v676_v2, %v675_v1  ;;  %948 = vmatpush.msrb.mxu1 %v928_v52 }
 0x59e   :  { %v678_v4 = vrot.slane %v677_v3, 2  ;;  %949 = vmatpush.msrb.mxu1 %v927_v54 }
 0x5a0   :  { %v679_v5 = vadd.f32 %v678_v4, %v677_v3  ;;  %950 = vmatpush.msrb.mxu1 %v926_v55  ;;  %v923_v3 = vld [vmem:[#allocation14 + $0x10] sm:$0xff]  ;;  %v922_v4 = vld [vmem:[#allocation14 + $0x8] sm:$0xff] }
 0x5a2   :  { %v680_v7 = vrot.slane %v679_v5, 1  ;;  %951 = vmatpush.msrb.mxu1 %v925_v56 }
 0x5a4   :  { %v681_v9 = vadd.f32 %v680_v7, %v679_v5  ;;  %952 = vmatpush.msrb.mxu1 %v924_v58  ;;  %v921_v5 = vld [vmem:[#allocation14] sm:$0xff] }
 0x5a5   :  { %v1045_v7 = vld [vmem:[%s1631_s18] ss:$0 sm:$0xff]  ;;  %s974_s18 = sshll.u32 %s1320_s24, 4  ;;  %s975_s18 = int_to_ptr.vmem [resolvable:$true] %s974_s18 }
 0x5a6   :  { %v682_v10 = vmul.f32 %v681_v9, %v1526_v44  ;;  %953 = vmatpush.msrb.mxu1 %v923_v3 }
 0x5a8   :  { %v683_v11 = vadd.f32 1e-05, %v682_v10  ;;  %954 = vmatpush.msrb.mxu1 %v922_v4 }
 0x5aa   :  { %1054 = vrsqrt.f32 %v683_v11  ;;  %vm690_vm14 = vweird.f32 %v683_v11  ;;  %955 = vmatpush.msrb.mxu1 %v921_v5 }
 0x5b0   :  { %v1055_v12 = vpop.eup %1054 }
 0x5b1   :  { %v685_v13 = vmul.f32 %v1055_v12, %v683_v11  ;;  %vm691_vm13 = vweird.f32 %v1055_v12 }
 0x5b2   :  { %vm692_vm15 = vmor %vm690_vm14, %vm691_vm13 }
 0x5b3   :  { %v686_v15 = vmul.f32 %v1055_v12, %v685_v13 }
 0x5b5   :  { %v687_v18 = vmul.f32 0.5, %v686_v15 }
 0x5b7   :  { %v688_v20 = vsub.f32 1.5, %v687_v18 }
 0x5b9   :  { %v689_v21 = vmul.f32 %v1055_v12, %v688_v20  ;;  %v1047_v20 = vld [vmem:[%s1635_s22] ss:$0 sm:$0xff] }
 0x5bb   :  { %v693_v22 = vsel %vm692_vm15, %v1055_v12, %v689_v21  ;;  %v1046_v12 = vld [vmem:[%s1633_s20] ss:$0 sm:$0xff] }
 0x5bc   :  { %v695_v23 = vmul.f32 %v693_v22, %v670_v60  ;;  %v694_v44 = vmul.f32 %v693_v22, %v669_v59  ;;  %v806_v60 = vpop.f32.mrf.mxu3 }
 0x5be   :  { %1014 = vmatpush.msk.msra.mxu0 %vm268_vm2, %v695_v23 }
 0x5c0   :  { %714 = vmatpush.msra.mxu0 %v694_v44 }
 0x5c1   :  { %1015 = vmatmul.msk.f32.vlgmr.msra.gmra.mxu0 %vm234_vm1, %v1536_v8  ;;  %v729_v8 = vld [vmem:[#allocation11 + $0x50] sm:$0xff]  ;;  %vm967_vm1 = vcmask 779264  }
 0x5c2   :  { %758 = vmatpush.msrb.mxu0 %v726_v24 }
 0x5c4   :  { %759 = vmatpush.msrb.mxu0 %v725_v25 }
 0x5c6   :  { %760 = vmatpush.msrb.mxu0 %v724_v26 }
 0x5c8   :  { %761 = vmatpush.msrb.mxu0 %v723_v27 }
 0x5c9   :  { %1016 = vmatmul.msk.f32.vlgmr.msrb.gmra.mxu0 %vm300_vm4, %v1567_v6  ;;  %v891_v6 = vld [vmem:[#allocation13 + $0x58] sm:$0xff] }
 0x5ca   :  { %821 = vmatpush.msra.mxu0 %v734_v28  ;;  %904 = vmatpush.msrb.mxu2 %v891_v6 }
 0x5cc   :  { %822 = vmatpush.msra.mxu0 %v733_v29  ;;  %905 = vmatpush.msrb.mxu2 %v890_v36 }
 0x5ce   :  { %823 = vmatpush.msra.mxu0 %v732_v30  ;;  %906 = vmatpush.msrb.mxu2 %v889_v37 }
 0x5d0   :  { %824 = vmatpush.msra.mxu0 %v731_v31  ;;  %907 = vmatpush.msrb.mxu2 %v888_v38 }
 0x5d1   :  { %1019 = vmatmul.msk.f32.vlgmr.msra.gmra.mxu0 %vm300_vm4, %v1543_v16  ;;  %v885_v16 = vld [vmem:[#allocation13 + $0x28] sm:$0xff] }
 0x5d2   :  { %844 = vmatpush.msrb.mxu0 %v730_v32  ;;  %908 = vmatpush.msrb.mxu2 %v887_v39 }
 0x5d4   :  { %845 = vmatpush.msrb.mxu0 %v729_v8  ;;  %909 = vmatpush.msrb.mxu2 %v886_v40 }
 0x5d6   :  { %846 = vmatpush.msrb.mxu0 %v728_v33  ;;  %910 = vmatpush.msrb.mxu2 %v885_v16 }
 0x5d8   :  { %847 = vmatpush.msrb.mxu0 %v727_v34  ;;  %911 = vmatpush.msrb.mxu2 %v884_v41 }
 0x5da   :  { %912 = vmatpush.msrb.mxu2 %v883_v43 }
 0x5dc   :  { %913 = vmatpush.msrb.mxu2 %v882_v45 }
 0x5de   :  { %914 = vmatpush.msrb.mxu2 %v881_v46 }
 0x5e0   :  { %915 = vmatpush.msrb.mxu2 %v880_v47 }
 0x63e   :  { %v716_v42 = vpop.f32.mrf.mxu0 }
 0x63f   :  { %1020 = vmatmul.msk.f32.vlgmr.msrb.gmra.mxu0 %vm300_vm4, %v716_v42  ;;  %1021 = vmatmul.msk.f32.vlgmr.msrb.gmra.mxu3 %vm300_vm4, %v716_v42 }
 0x646   :  { %v763_v53 = vpop.f32.mrf.mxu0 }
 0x647   :  { %v807_v61 = vadd.f32 %v806_v60, %v763_v53 }
 0x64e   :  { %v826_v59 = vpop.f32.mrf.mxu0 }
 0x64f   :  { %v827_v15 = vadd.f32 %v826_v59, %v783_v57 }
 0x6bc   :  { %v849_v63 = vpop.f32.mrf.mxu0 }
 0x6bd   :  { %v872_v0 = vadd.f32 %v849_v63, %v807_v61 }
 0x6bf   :  { %v878_v1 = vadd.f32 %v1044_v62, %v872_v0 }
 0x6c1   :  { %v879_v2 = vmax.f32 %v878_v1, 0.0 }
 0x6c2   :  { %v869_v13 = vpop.f32.mrf.mxu3 }
 0x6c3   :  { %1022 = vmatmul.msk.f32.vlgmr.msrb.gmra.mxu2 %vm896_vm0, %v879_v2  ;;  %v873_v18 = vadd.f32 %v869_v13, %v827_v15 }
 0x746   :  { %v917_v9 = vpop.f32.mrf.mxu2 }
 0x747   :  { %v918_v10 = vadd.f32 %v1045_v7, %v917_v9 }
 0x749   :  { %v920_v11 = vmax.f32 %v918_v10, 0.0 }
 0x74b   :  { %1023 = vmatmul.msk.f32.vlgmr.msrb.gmra.mxu1 %vm896_vm0, %v920_v11 }
 0x7c8   :  { %v957_v14 = vpop.f32.mrf.mxu1 }
 0x7c9   :  { %v958_v17 = vadd.f32 %v1046_v12, %v957_v14 }
 0x7cb   :  { %v960_v19 = vmax.f32 %v958_v17, 0.0 }
 0x7cd   :  { %v961_v21 = vadd.f32 %v960_v19, %v873_v18 }
 0x7cf   :  { %v966_v22 = vadd.f32 %v1047_v20, %v961_v21 }
 0x7d1   :  { %968 = vst.msk [vmem:[#allocation17] sm:$0x3] %vm967_vm1, %v966_v22 }
 0x7d2   :  { %979 = dma.vmem_to_hbm [thread:$0]  %s975_s18, 32, %s977_s2, [#allocation4]  }
 0x7d3   :  { %1306 = dma.done.wait [#allocation4], 32  }
 0x7d4   :  { %1307 = vsyncadd [#allocation4], 4294967264 }
 0x7d5   :  { %984 = vsyncpa [#allocation3], 1 }
 0x7d6   :  { %985 = vsyncpa [#allocation6], 1 }
 0x7d7   :  { %986 = vsyncpa [#allocation9], 1 }
 0x7d8   :  { %987 = vsyncpa [#allocation12], 1 }
 0x7d9   :  { %988 = vsyncpa [#allocation15], 1 }
 0x7da   :  { %989 = vsyncpa [#allocation4], 1 }

</bundles_post_ra>
